<compile_context>
chip_gen: v7x
topology: tpu7x:2x2x1
jax: 0.10.0
libtpu: 0.0.40
codegen_flags: <defaults>
</compile_context>

<pallas_src>
import jax
import jax.numpy as jnp
from jax.experimental import pallas as pl
from jax.experimental.pallas import tpu as pltpu

_LANE = 128
_SUBLANE = 8


def _round_up(x, m):
    return ((x + m - 1) // m) * m


def _partial_loss_kernel(mat_ref, prob_ref, num_ref, sq_ref):
    """One row tile of M -> per-cluster partial numerator and partial sum(p^2)."""
    i = pl.program_id(0)
    tm = mat_ref.shape[0]
    k_pad = prob_ref.shape[1]

    m_tile = mat_ref[...].astype(jnp.float32)          # (TM, N_pad)
    p_full = prob_ref[...]                              # (N_pad, K_pad) f32

    # Y[r, k] = sum_c M[r, c] * P[c, k]   (single MXU matmul per tile)
    y = jnp.dot(m_tile, p_full, preferred_element_type=jnp.float32)   # (TM, K_pad)

    # Rows of P corresponding to this row tile of M (P is fully resident).
    row0 = pl.multiple_of(i * tm, tm)
    p_tile = prob_ref[pl.ds(row0, tm), :]                              # (TM, K_pad)

    partial_num = jnp.sum(p_tile * y, axis=0, keepdims=True)           # (1, K_pad)
    partial_sq = jnp.sum(p_tile * p_tile, axis=0, keepdims=True)       # (1, K_pad)

    # (8, 128)-shaped lane/sublane-dense unmasked stores; the wrapper only
    # consumes sublane 0.
    num_ref[...] = jnp.broadcast_to(partial_num, (_SUBLANE, k_pad))
    sq_ref[...] = jnp.broadcast_to(partial_sq, (_SUBLANE, k_pad))


def prob_balanced_ratio_loss(mat, prob, *, tile_rows=256,
                             slab_budget_bytes=16 * 1024 * 1024):
    """mat: (N, N) dense Laplacian-like matrix; prob: (N, K) probabilities."""
    n, k = prob.shape
    assert mat.shape == (n, n)

    # Pad cluster dim to 128 lanes; pad node dim to a multiple of 128 and of TM.
    k_pad = max(_LANE, _round_up(k, _LANE))
    n_lane = _round_up(n, _LANE)

    # Pick the largest row tile whose double-buffered M slab fits the budget.
    # (For extremely wide N on v5e one would add a column/reduction grid axis;
    #  shrinking TM covers practical sizes here.)
    bytes_per_elt = jnp.dtype(mat.dtype).itemsize
    tm = tile_rows
    while tm > _SUBLANE and 2 * tm * n_lane * bytes_per_elt > slab_budget_bytes:
        tm //= 2
    tm = min(tm, n_lane)
    n_pad = _round_up(n_lane, tm)
    num_tiles = n_pad // tm

    # Zero padding is mathematically inert: padded rows/cols of P are zero
    # (contribute 0 to num and sum(p^2)); padded clusters give 0 / (0 + 1) = 0.
    mat_p = jnp.zeros((n_pad, n_pad), mat.dtype).at[:n, :n].set(mat)
    prob_p = jnp.zeros((n_pad, k_pad), jnp.float32).at[:n, :k].set(
        prob.astype(jnp.float32))

    out_shape = jax.ShapeDtypeStruct((num_tiles, _SUBLANE, k_pad), jnp.float32)

    partial_num, partial_sq = pl.pallas_call(
        _partial_loss_kernel,
        out_shape=(out_shape, out_shape),
        grid=(num_tiles,),
        in_specs=[
            # Stream row tiles of M (double-buffered DMA).
            pl.BlockSpec((tm, n_pad), lambda i: (i, 0)),
            # P fully resident in VMEM (constant block index -> fetched once).
            pl.BlockSpec((n_pad, k_pad), lambda i: (0, 0)),
        ],
        out_specs=(
            pl.BlockSpec((None, _SUBLANE, k_pad), lambda i: (i, 0, 0)),
            pl.BlockSpec((None, _SUBLANE, k_pad), lambda i: (i, 0, 0)),
        ),
        compiler_params=pltpu.CompilerParams(
            dimension_semantics=("parallel",),       # shard row tiles over TCs
            vmem_limit_bytes=48 * 1024 * 1024,       # headroom, < v7x 64 MiB
        ),
    )(mat_p, prob_p)

    num = jnp.sum(partial_num[:, 0, :], axis=0)          # (K_pad,)
    den = jnp.sum(partial_sq[:, 0, :], axis=0) + 1.0     # (K_pad,)
    loss = jnp.sum(num / den)                            # padded k -> 0/1 = 0
    return loss.reshape((1,))


def build_mat(A_p, A_n):
    """M = diag(rowsum(A_p)) - (A_p - A_n); dense version of the sparse __init__."""
    D_p = jnp.diag(jnp.sum(A_p, axis=1))
    return D_p - (A_p - A_n)


def _reference_loss(mat, prob):
    """Pure-JAX reference mirroring the PyTorch per-column loop."""
    total = jnp.zeros((1,), jnp.float32)
    for k in range(prob.shape[-1]):
        p = prob[:, k:k + 1]
        den = (p.T @ p + 1.0)[0, 0]
        num = (p.T @ (mat @ p))[0, 0]
        total = total + num / den
    return total


if __name__ == "__main__":
    N, K = 16, 4  # nodes, clusters

    key = jax.random.PRNGKey(0)
    k1, k2, k3, k4, k5 = jax.random.split(key, 5)

    # Deterministic synthetic sparse-ish non-negative adjacency parts.
    ap_vals = jax.random.uniform(k1, (N, N), jnp.float32)
    ap_mask = (jax.random.uniform(k2, (N, N), jnp.float32) < 0.3).astype(jnp.float32)
    A_p = ap_vals * ap_mask * (1.0 - jnp.eye(N, dtype=jnp.float32))

    an_vals = jax.random.uniform(k3, (N, N), jnp.float32)
    an_mask = (jax.random.uniform(k4, (N, N), jnp.float32) < 0.2).astype(jnp.float32)
    A_n = an_vals * an_mask * (1.0 - jnp.eye(N, dtype=jnp.float32))

    mat = build_mat(A_p, A_n)                                  # (N, N)

    # Prediction probability matrix (rows sum to 1), like a softmax output.
    prob = jax.nn.softmax(jax.random.normal(k5, (N, K), jnp.float32), axis=-1)

    loss = jax.jit(prob_balanced_ratio_loss)(mat, prob)
    jax.block_until_ready(loss)

    ref = _reference_loss(mat, prob)
    assert jnp.allclose(loss, ref, rtol=1e-5, atol=1e-5), (loss, ref)

    print("KERNEL_OK")
</pallas_src>

<mosaic_0001>
module attributes {stable_mosaic.version = 11 : i64} {
  func.func @_partial_loss_kernel(%arg0: i32, %arg1: memref<128x128xf32, #tpu.memory_space<vmem>>, %arg2: memref<128x128xf32, #tpu.memory_space<vmem>>, %arg3: memref<1x8x128xf32, #tpu.memory_space<vmem>>, %arg4: memref<1x8x128xf32, #tpu.memory_space<vmem>>) attributes {dimension_semantics = [#tpu.dimension_semantics<parallel>], iteration_bounds = array<i64: 1>, scalar_prefetch = 0 : i64, scratch_operands = 0 : i64, tpu.core_type = #tpu.core_type<tc>, window_params = [{transform_indices = @transform_0, window_bounds = array<i64: 128, 128>}, {pipeline_mode = #tpu.pipeline_mode<synchronous>, transform_indices = @transform_1, window_bounds = array<i64: 128, 128>}, {transform_indices = @transform_2, window_bounds = array<i64: 1, 8, 128>}, {transform_indices = @transform_3, window_bounds = array<i64: 1, 8, 128>}]} {
    %c0 = arith.constant 0 : index
    %c0_0 = arith.constant 0 : index
    %0 = vector.load %arg1[%c0, %c0_0] : memref<128x128xf32, #tpu.memory_space<vmem>>, vector<128x128xf32>
    %c0_1 = arith.constant 0 : index
    %c0_2 = arith.constant 0 : index
    %1 = vector.load %arg2[%c0_1, %c0_2] : memref<128x128xf32, #tpu.memory_space<vmem>>, vector<128x128xf32>
    %cst = arith.constant dense<0.000000e+00> : vector<128x128xf32>
    %2 = tpu.matmul %0, %1, %cst {dimension_numbers = #tpu.dot_dimension_numbers<[1], [0], [0], [1], [0, 0, 1, 1], [], []>} : vector<128x128xf32>, vector<128x128xf32>, vector<128x128xf32> -> vector<128x128xf32>
    %c128_i32 = arith.constant 128 : i32
    %3 = arith.muli %arg0, %c128_i32 : i32
    %4 = tpu.assume_multiple %3, 128 : i32
    %5 = arith.index_cast %4 : i32 to index
    %c0_3 = arith.constant 0 : index
    %6 = vector.load %arg2[%5, %c0_3] : memref<128x128xf32, #tpu.memory_space<vmem>>, vector<128x128xf32>
    %7 = arith.mulf %6, %2 : vector<128x128xf32>
    %cst_4 = arith.constant dense<0.000000e+00> : vector<128xf32>
    %8 = vector.multi_reduction <add>, %7, %cst_4 [0] : vector<128x128xf32> to vector<128xf32>
    %9 = vector.shape_cast %8 : vector<128xf32> to vector<1x128xf32>
    %10 = arith.mulf %6, %6 : vector<128x128xf32>
    %cst_5 = arith.constant dense<0.000000e+00> : vector<128xf32>
    %11 = vector.multi_reduction <add>, %10, %cst_5 [0] : vector<128x128xf32> to vector<128xf32>
    %12 = vector.shape_cast %11 : vector<128xf32> to vector<1x128xf32>
    %13 = vector.shape_cast %9 : vector<1x128xf32> to vector<1x128xf32>
    %14 = vector.broadcast %13 : vector<1x128xf32> to vector<8x128xf32>
    %c0_6 = arith.constant 0 : index
    %c0_7 = arith.constant 0 : index
    %c0_8 = arith.constant 0 : index
    %15 = vector.load %arg3[%c0_6, %c0_7, %c0_8] : memref<1x8x128xf32, #tpu.memory_space<vmem>>, vector<1x8x128xf32>
    %16 = vector.shape_cast %15 : vector<1x8x128xf32> to vector<8x128xf32>
    %17 = vector.shape_cast %14 : vector<8x128xf32> to vector<1x8x128xf32>
    tpu.vector_store %arg3[%c0_6, %c0_7, %c0_8], %17 {strides = array<i32>} : memref<1x8x128xf32, #tpu.memory_space<vmem>>, vector<1x8x128xf32>,
    %18 = vector.shape_cast %12 : vector<1x128xf32> to vector<1x128xf32>
    %19 = vector.broadcast %18 : vector<1x128xf32> to vector<8x128xf32>
    %c0_9 = arith.constant 0 : index
    %c0_10 = arith.constant 0 : index
    %c0_11 = arith.constant 0 : index
    %20 = vector.load %arg4[%c0_9, %c0_10, %c0_11] : memref<1x8x128xf32, #tpu.memory_space<vmem>>, vector<1x8x128xf32>
    %21 = vector.shape_cast %20 : vector<1x8x128xf32> to vector<8x128xf32>
    %22 = vector.shape_cast %19 : vector<8x128xf32> to vector<1x8x128xf32>
    tpu.vector_store %arg4[%c0_9, %c0_10, %c0_11], %22 {strides = array<i32>} : memref<1x8x128xf32, #tpu.memory_space<vmem>>, vector<1x8x128xf32>,
    return
  }
  func.func @transform_0(%arg0: i32) -> (i32, i32) {
    %c0_i32 = arith.constant 0 : i32
    %c0_i32_0 = arith.constant 0 : i32
    return %arg0, %c0_i32 : i32, i32
  }
  func.func @transform_1(%arg0: i32) -> (i32, i32) {
    %c0_i32 = arith.constant 0 : i32
    %c0_i32_0 = arith.constant 0 : i32
    %c0_i32_1 = arith.constant 0 : i32
    return %c0_i32, %c0_i32_0 : i32, i32
  }
  func.func @transform_2(%arg0: i32) -> (i32, i32, i32) {
    %c0_i32 = arith.constant 0 : i32
    %c0_i32_0 = arith.constant 0 : i32
    %c0_i32_1 = arith.constant 0 : i32
    return %arg0, %c0_i32, %c0_i32_0 : i32, i32, i32
  }
  func.func @transform_3(%arg0: i32) -> (i32, i32, i32) {
    %c0_i32 = arith.constant 0 : i32
    %c0_i32_0 = arith.constant 0 : i32
    %c0_i32_1 = arith.constant 0 : i32
    return %arg0, %c0_i32, %c0_i32_0 : i32, i32, i32
  }
}

</mosaic_0001>

<bundles_post_ra>
// kernel: prob_balanced_ratio_loss.1
= control target key start
LH: loop header
LB: loop body
LE: loop exit
PB: predicated region body
PF: predicated region fallthrough
CT: control target
= control target key end

     0   :  { %s646_s1 = inlined_call_operand.vmem [shape: f32[128,128], index: 1, kind: input, shape index: {}]   ;;  %s647_s0 = inlined_call_operand.vmem [shape: f32[128,128], index: 0, kind: input, shape index: {}]   ;;  %s648_s3 = inlined_call_operand.vmem [shape: f32[1,8,128], index: 3, kind: output, shape index: {1}]   ;;  %s649_s2 = inlined_call_operand.vmem [shape: f32[1,8,128], index: 2, kind: output, shape index: {0}]  }
   0x1   :  { %v451_v0 = vld [vmem:[%s646_s1] sm:$0xff]  ;;  %v456_v1 = vld [vmem:[%s646_s1 + $0x8] sm:$0xff]  ;;  %v461_v2 = vld [vmem:[%s646_s1 + $0x10] sm:$0xff] }
   0x2   :  { %v380_v3 = vpack.c.bf16 %v456_v1, %v451_v0  ;;  %v468_v4 = vld [vmem:[%s646_s1 + $0x18] sm:$0xff]  ;;  %v475_v6 = vld [vmem:[%s646_s1 + $0x20] sm:$0xff]  ;;  %v480_v7 = vld [vmem:[%s646_s1 + $0x28] sm:$0xff]  ;;  %v246_v40 = vmul.f32 %v456_v1, %v456_v1  ;;  %v245_v41 = vmul.f32 %v451_v0, %v451_v0  ;;  %v247_v44 = vmul.f32 %v461_v2, %v461_v2 }
   0x3   :  { %v384_v5 = vpack.c.bf16 %v468_v4, %v461_v2  ;;  %v388_v8 = vpack.c.bf16 %v480_v7, %v475_v6  ;;  %v13_v9 = vld [vmem:[%s647_s0] sm:$0xff]  ;;  %v490_v10 = vld [vmem:[%s646_s1 + $0x30] sm:$0xff]  ;;  %v495_v11 = vld [vmem:[%s646_s1 + $0x38] sm:$0xff]  ;;  %v248_v43 = vmul.f32 %v468_v4, %v468_v4  ;;  %v250_v46 = vmul.f32 %v480_v7, %v480_v7 }
   0x4   :  { %381 = vmatprep.subr.bf16.mxu0 %v380_v3  ;;  %412 = vmatprep.subr.bf16.mxu1 %v380_v3  ;;  %v21_v12 = vld [vmem:[%s647_s0 + $0x40] sm:$0xff]  ;;  %v392_v13 = vpack.c.bf16 %v495_v11, %v490_v10  ;;  %v510_v15 = vld [vmem:[%s646_s1 + $0x48] sm:$0xff]  ;;  %v517_v17 = vld [vmem:[%s646_s1 + $0x50] sm:$0xff]  ;;  %v261_v42 = vadd.f32 %v246_v40, %v245_v41  ;;  %v249_v47 = vmul.f32 %v475_v6, %v475_v6 }
   0x5   :  { %383 = vmatpush3.bf16.msra.mxu0 %v380_v3  ;;  %420 = vmatpush3.bf16.msra.mxu1 %v380_v3  ;;  %v505_v14 = vld [vmem:[%s646_s1 + $0x40] sm:$0xff]  ;;  %v522_v18 = vld [vmem:[%s646_s1 + $0x58] sm:$0xff]  ;;  %v534_v21 = vld [vmem:[%s646_s1 + $0x68] sm:$0xff]  ;;  %v252_v50 = vmul.f32 %v495_v11, %v495_v11  ;;  %v251_v51 = vmul.f32 %v490_v10, %v490_v10  ;;  %v254_v54 = vmul.f32 %v510_v15, %v510_v15 }
   0x6   :  { %385 = vmatprep.subr.bf16.mxu0 %v384_v5  ;;  %413 = vmatprep.subr.bf16.mxu1 %v384_v5  ;;  %v396_v16 = vpack.c.bf16 %v510_v15, %v505_v14  ;;  %v400_v19 = vpack.c.bf16 %v522_v18, %v517_v17  ;;  %v529_v20 = vld [vmem:[%s646_s1 + $0x60] sm:$0xff]  ;;  %v541_v23 = vld [vmem:[%s646_s1 + $0x70] sm:$0xff]  ;;  %v546_v24 = vld [vmem:[%s646_s1 + $0x78] sm:$0xff]  ;;  %v262_v45 = vadd.f32 %v261_v42, %v247_v44 }
   0x7   :  { %356 = vmatprep.mubr.f32.mxu0 %v13_v9  ;;  %368 = vmatprep.mubr.f32.mxu1 %v21_v12  ;;  %v404_v22 = vpack.c.bf16 %v534_v21, %v529_v20  ;;  %v408_v25 = vpack.c.bf16 %v546_v24, %v541_v23  ;;  %v14_v26 = vld [vmem:[%s647_s0 + $0x8] sm:$0xff]  ;;  %v15_v28 = vld [vmem:[%s647_s0 + $0x10] sm:$0xff]  ;;  %v16_v30 = vld [vmem:[%s647_s0 + $0x18] sm:$0xff]  ;;  %v253_v55 = vmul.f32 %v505_v14, %v505_v14 }
   0x8   :  { %v22_v27 = vld [vmem:[%s647_s0 + $0x48] sm:$0xff]  ;;  %v23_v29 = vld [vmem:[%s647_s0 + $0x50] sm:$0xff]  ;;  %v24_v31 = vld [vmem:[%s647_s0 + $0x58] sm:$0xff]  ;;  %v263_v48 = vadd.f32 %v262_v45, %v248_v43  ;;  %v256_v58 = vmul.f32 %v522_v18, %v522_v18  ;;  %v255_v59 = vmul.f32 %v517_v17, %v517_v17  ;;  %v258_v62 = vmul.f32 %v534_v21, %v534_v21 }
   0x9   :  { %387 = vmatpush3.bf16.msra.mxu0 %v384_v5  ;;  %421 = vmatpush3.bf16.msra.mxu1 %v384_v5  ;;  %v17_v32 = vld [vmem:[%s647_s0 + $0x20] sm:$0xff]  ;;  %v18_v34 = vld [vmem:[%s647_s0 + $0x28] sm:$0xff]  ;;  %v19_v36 = vld [vmem:[%s647_s0 + $0x30] sm:$0xff]  ;;  %v257_v63 = vmul.f32 %v529_v20, %v529_v20  ;;  %v259_v9 = vmul.f32 %v541_v23, %v541_v23 }
   0xa   :  { %389 = vmatprep.subr.bf16.mxu0 %v388_v8  ;;  %414 = vmatprep.subr.bf16.mxu1 %v388_v8  ;;  %v25_v33 = vld [vmem:[%s647_s0 + $0x60] sm:$0xff]  ;;  %v26_v35 = vld [vmem:[%s647_s0 + $0x68] sm:$0xff]  ;;  %v27_v37 = vld [vmem:[%s647_s0 + $0x70] sm:$0xff]  ;;  %v264_v49 = vadd.f32 %v263_v48, %v249_v47 }
   0xb   :  { %v20_v38 = vld [vmem:[%s647_s0 + $0x38] sm:$0xff] }
   0xc   :  { %v28_v39 = vld [vmem:[%s647_s0 + $0x78] sm:$0xff]  ;;  %v265_v52 = vadd.f32 %v264_v49, %v250_v46 }
   0xd   :  { %391 = vmatpush3.bf16.msra.mxu0 %v388_v8  ;;  %422 = vmatpush3.bf16.msra.mxu1 %v388_v8  ;;  %v260_v8 = vmul.f32 %v546_v24, %v546_v24 }
   0xe   :  { %393 = vmatprep.subr.bf16.mxu0 %v392_v13  ;;  %415 = vmatprep.subr.bf16.mxu1 %v392_v13  ;;  %v266_v53 = vadd.f32 %v265_v52, %v251_v51 }
  0x10   :  { %v267_v56 = vadd.f32 %v266_v53, %v252_v50 }
  0x11   :  { %395 = vmatpush3.bf16.msra.mxu0 %v392_v13  ;;  %423 = vmatpush3.bf16.msra.mxu1 %v392_v13 }
  0x12   :  { %397 = vmatprep.subr.bf16.mxu0 %v396_v16  ;;  %416 = vmatprep.subr.bf16.mxu1 %v396_v16  ;;  %v268_v57 = vadd.f32 %v267_v56, %v253_v55 }
  0x14   :  { %v269_v60 = vadd.f32 %v268_v57, %v254_v54 }
  0x15   :  { %399 = vmatpush3.bf16.msra.mxu0 %v396_v16  ;;  %424 = vmatpush3.bf16.msra.mxu1 %v396_v16 }
  0x16   :  { %401 = vmatprep.subr.bf16.mxu0 %v400_v19  ;;  %417 = vmatprep.subr.bf16.mxu1 %v400_v19  ;;  %v270_v61 = vadd.f32 %v269_v60, %v255_v59 }
  0x18   :  { %v271_v3 = vadd.f32 %v270_v61, %v256_v58 }
  0x19   :  { %403 = vmatpush3.bf16.msra.mxu0 %v400_v19  ;;  %425 = vmatpush3.bf16.msra.mxu1 %v400_v19 }
  0x1a   :  { %405 = vmatprep.subr.bf16.mxu0 %v404_v22  ;;  %418 = vmatprep.subr.bf16.mxu1 %v404_v22  ;;  %v272_v5 = vadd.f32 %v271_v3, %v257_v63 }
  0x1c   :  { %v273_v12 = vadd.f32 %v272_v5, %v258_v62 }
  0x1d   :  { %407 = vmatpush3.bf16.msra.mxu0 %v404_v22  ;;  %426 = vmatpush3.bf16.msra.mxu1 %v404_v22 }
  0x1e   :  { %409 = vmatprep.subr.bf16.mxu0 %v408_v25  ;;  %419 = vmatprep.subr.bf16.mxu1 %v408_v25  ;;  %v274_v13 = vadd.f32 %v273_v12, %v259_v9 }
  0x20   :  { %v275_v16 = vadd.f32 %v274_v13, %v260_v8 }
  0x21   :  { %411 = vmatpush3.bf16.msra.mxu0 %v408_v25  ;;  %427 = vmatpush3.bf16.msra.mxu1 %v408_v25 }
  0x22   :  { %v276_v19 = vrot.slane %v275_v16, 4 }
  0x24   :  { %357 = vmatmul.mubr.f32.vlgmr.msra.gmra.mrb[0].mxu0 %v14_v26  ;;  %369 = vmatmul.mubr.f32.vlgmr.msra.gmra.mrb[0].mxu1 %v22_v27  ;;  %v277_v22 = vadd.f32 %v276_v19, %v275_v16 }
  0x25   :  { %359 = vmatprep.mubr.f32.mxu0 %v15_v28  ;;  %371 = vmatprep.mubr.f32.mxu1 %v23_v29 }
  0x26   :  { %v278_v25 = vrot.slane %v277_v22, 2 }
  0x28   :  { %360 = vmatmul.mubr.f32.gmra.mrb[2].mxu0 %v16_v30  ;;  %372 = vmatmul.mubr.f32.gmra.mrb[2].mxu1 %v24_v31  ;;  %v279_v26 = vadd.f32 %v278_v25, %v277_v22 }
  0x29   :  { %362 = vmatprep.mubr.f32.mxu0 %v17_v32  ;;  %374 = vmatprep.mubr.f32.mxu1 %v25_v33 }
  0x2a   :  { %v280_v27 = vrot.slane %v279_v26, 1 }
  0x2c   :  { %363 = vmatmul.mubr.f32.gmra.mrb[4].mxu0 %v18_v34  ;;  %375 = vmatmul.mubr.f32.gmra.mrb[4].mxu1 %v26_v35  ;;  %v281_v28 = vadd.f32 %v280_v27, %v279_v26 }
  0x2d   :  { %365 = vmatprep.mubr.f32.mxu0 %v19_v36  ;;  %377 = vmatprep.mubr.f32.mxu1 %v27_v37 }
  0x2e   :  { %283 = vst [vmem:[%s648_s3] sm:$0xff] %v281_v28 }
  0x30   :  { %366 = vmatmul.mubr.f32.gmra.mrb[6].mxu0 %v20_v38  ;;  %378 = vmatmul.mubr.f32.gmra.mrb[6].mxu1 %v28_v39 }
  0xf7   :  { %v358_v29 = vpop.f32.mrb[0].mxu0  ;;  %v370_v30 = vpop.f32.mrb[0].mxu1 }
  0xf8   :  { %v209_v31 = vmul.f32 %v358_v29, %v456_v1  ;;  %v111_v32 = vpop.f32.mrb[1].mxu0  ;;  %v151_v33 = vpop.f32.mrb[1].mxu1  ;;  %v217_v57 = vmul.f32 %v370_v30, %v510_v15 }
  0xf9   :  { %v208_v34 = vmul.f32 %v111_v32, %v451_v0  ;;  %v216_v55 = vmul.f32 %v151_v33, %v505_v14 }
  0xfb   :  { %v224_v35 = vadd.f32 %v209_v31, %v208_v34  ;;  %v361_v36 = vpop.f32.mrb[2].mxu0  ;;  %v373_v37 = vpop.f32.mrb[2].mxu1 }
  0xfc   :  { %v121_v38 = vpop.f32.mrb[3].mxu0  ;;  %v161_v39 = vpop.f32.mrb[3].mxu1  ;;  %v211_v41 = vmul.f32 %v361_v36, %v468_v4  ;;  %v219_v59 = vmul.f32 %v373_v37, %v522_v18 }
  0xfd   :  { %v210_v40 = vmul.f32 %v121_v38, %v461_v2  ;;  %v218_v58 = vmul.f32 %v161_v39, %v517_v17 }
  0xff   :  { %v225_v42 = vadd.f32 %v224_v35, %v210_v40  ;;  %v364_v43 = vpop.f32.mrb[4].mxu0  ;;  %v376_v44 = vpop.f32.mrb[4].mxu1 }
 0x100   :  { %v131_v45 = vpop.f32.mrb[5].mxu0  ;;  %v171_v46 = vpop.f32.mrb[5].mxu1  ;;  %v213_v48 = vmul.f32 %v364_v43, %v480_v7 }
 0x101   :  { %v212_v1 = vmul.f32 %v131_v45, %v475_v6  ;;  %v226_v47 = vadd.f32 %v225_v42, %v211_v41  ;;  %v220_v61 = vmul.f32 %v171_v46, %v529_v20 }
 0x103   :  { %v227_v0 = vadd.f32 %v226_v47, %v212_v1  ;;  %v367_v49 = vpop.f32.mrb[6].mxu0  ;;  %v379_v50 = vpop.f32.mrb[6].mxu1 }
 0x104   :  { %v141_v51 = vpop.f32.mrb[7].mxu0  ;;  %v181_v52 = vpop.f32.mrb[7].mxu1  ;;  %v215_v4 = vmul.f32 %v367_v49, %v495_v11  ;;  %v223_v14 = vmul.f32 %v379_v50, %v546_v24 }
 0x105   :  { %v214_v53 = vmul.f32 %v141_v51, %v490_v10  ;;  %v228_v2 = vadd.f32 %v227_v0, %v213_v48  ;;  %v221_v10 = vmul.f32 %v376_v44, %v534_v21  ;;  %v222_v11 = vmul.f32 %v181_v52, %v541_v23 }
 0x107   :  { %v229_v54 = vadd.f32 %v228_v2, %v214_v53 }
 0x109   :  { %v230_v56 = vadd.f32 %v229_v54, %v215_v4 }
 0x10b   :  { %v231_v6 = vadd.f32 %v230_v56, %v216_v55 }
 0x10d   :  { %v232_v7 = vadd.f32 %v231_v6, %v217_v57 }
 0x10f   :  { %v233_v60 = vadd.f32 %v232_v7, %v218_v58 }
 0x111   :  { %v234_v62 = vadd.f32 %v233_v60, %v219_v59 }
 0x113   :  { %v235_v63 = vadd.f32 %v234_v62, %v220_v61 }
 0x115   :  { %v236_v3 = vadd.f32 %v235_v63, %v221_v10 }
 0x117   :  { %v237_v5 = vadd.f32 %v236_v3, %v222_v11 }
 0x119   :  { %v238_v15 = vadd.f32 %v237_v5, %v223_v14 }
 0x11b   :  { %v239_v8 = vrot.slane %v238_v15, 4 }
 0x11d   :  { %v240_v9 = vadd.f32 %v239_v8, %v238_v15 }
 0x11f   :  { %v241_v17 = vrot.slane %v240_v9, 2 }
 0x121   :  { %v242_v12 = vadd.f32 %v241_v17, %v240_v9 }
 0x123   :  { %v243_v13 = vrot.slane %v242_v12, 1 }
 0x125   :  { %v244_v18 = vadd.f32 %v243_v13, %v242_v12 }
 0x127   :  { %282 = vst [vmem:[%s649_s2] sm:$0xff] %v244_v18 }

</bundles_post_ra>
